<compile_context>
chip_gen: v6e
topology: v6e:2x2x1
jax: 0.10.0
libtpu: 0.0.40
codegen_flags: <defaults>
</compile_context>

<pallas_src>
import functools

import jax
import jax.numpy as jnp
from jax import lax
from jax.experimental import pallas as pl
from jax.experimental.pallas import tpu as pltpu

KSIZE = 7
PAD = KSIZE // 2
NTAPS = KSIZE * KSIZE


# ---------------------------------------------------------------------------
# Primary kernel: conv expressed as an MXU matmul against a resident band
# matrix (bf16 hi/lo split, f32 accumulation).
# ---------------------------------------------------------------------------
def _spa_mxu_kernel(khi_ref, klo_ref, x_ref, o_ref):
    # khi_ref/klo_ref : VMEM (2*HW, HW) bf16, resident across all grid steps.
    # x_ref / o_ref   : VMEM (Nb, C, HW) f32 (lane-dense: HW on the lane axis).
    x = x_ref[...]                                  # short-lived: only for reductions
    avg = jnp.mean(x, axis=1)                       # (Nb, HW)  channel mean (f32)
    mx = jnp.max(x, axis=1)                         # (Nb, HW)  channel max

    am = jnp.concatenate([avg, mx], axis=-1)        # (Nb, 2*HW) f32
    # bf16 hi/lo split: am @ K ≈ hi@K_hi + hi@K_lo + lo@K_hi  (f32 accumulate).
    am_hi = am.astype(jnp.bfloat16)
    am_lo = (am - am_hi.astype(jnp.float32)).astype(jnp.bfloat16)

    khi = khi_ref[...]
    klo = klo_ref[...]
    acc = (jnp.dot(am_hi, khi, preferred_element_type=jnp.float32)
           + jnp.dot(am_hi, klo, preferred_element_type=jnp.float32)
           + jnp.dot(am_lo, khi, preferred_element_type=jnp.float32))

    att = jax.nn.sigmoid(acc)                       # (Nb, HW)
    # Re-read x from VMEM for the store instead of keeping it live across the
    # matmuls (keeps vreg pressure low; vld slots are plentiful).
    o_ref[...] = x_ref[...] * att[:, None, :]


# ---------------------------------------------------------------------------
# Fallback kernel for very large HW (band matrix would not fit in VMEM):
# roll-based conv, but with avg/max stacked along sublanes so each tap costs
# a single XLU roll (49 total instead of 98).
# ---------------------------------------------------------------------------
def _spa_roll_kernel(wm_ref, x_ref, o_ref, *, W, HW):
    # wm_ref: VMEM (2*NTAPS, HW) f32. Row k = avg-plane tap-k weight*validity,
    #         row NTAPS+k = max-plane tap-k weight*validity.
    x = x_ref[...]
    avg = jnp.mean(x, axis=1)                       # (Nb, HW)
    mx = jnp.max(x, axis=1)                         # (Nb, HW)
    nb = avg.shape[0]
    both = jnp.concatenate([avg, mx], axis=0)       # (2*Nb, HW) sublane-stacked

    acc_a = jnp.zeros_like(avg)
    acc_m = jnp.zeros_like(mx)
    for dy in range(KSIZE):
        for dx in range(KSIZE):
            k = dy * KSIZE + dx
            shift = (-((dy - PAD) * W + (dx - PAD))) % HW
            rolled = pltpu.roll(both, shift, axis=1) if shift else both
            acc_a = acc_a + rolled[:nb] * wm_ref[pl.ds(k, 1), :]
            acc_m = acc_m + rolled[nb:] * wm_ref[pl.ds(NTAPS + k, 1), :]

    att = jax.nn.sigmoid(acc_a + acc_m)
    o_ref[...] = x_ref[...] * att[:, None, :]


# ---------------------------------------------------------------------------
# Wrapper-side precomputation
# ---------------------------------------------------------------------------
def _conv_band_matrix(weight, H, W):
    """(1,2,7,7) conv weight -> K (2*HW, HW) s.t. conv(sp) == [avg|max] @ K.

    K[p*HW + s, d] = weight[0, p, sy-dy+3, sx-dx+3] when the source pixel s is
    within the 7x7 window of destination d, else 0.  Zero padding is implicit
    because out-of-image sources simply have no row.
    """
    w = jnp.asarray(weight, jnp.float32).reshape(2, KSIZE, KSIZE)
    HW = H * W
    idx = jnp.arange(HW)
    ry, rx = idx // W, idx % W
    oy = ry[:, None] - ry[None, :]                  # src_row - dst_row  (HW, HW)
    ox = rx[:, None] - rx[None, :]                  # src_col - dst_col
    valid = (jnp.abs(oy) <= PAD) & (jnp.abs(ox) <= PAD)
    ty = jnp.clip(oy + PAD, 0, KSIZE - 1)
    tx = jnp.clip(ox + PAD, 0, KSIZE - 1)
    zero = jnp.zeros((), jnp.float32)
    planes = [jnp.where(valid, w[p, ty, tx], zero) for p in range(2)]
    return jnp.concatenate(planes, axis=0)          # (2*HW, HW)


def _tap_weight_planes(weight, H, W):
    """(1,2,7,7) conv weight -> (2*49, H*W) per-tap weight*validity rows."""
    w = jnp.asarray(weight, jnp.float32).reshape(2, KSIZE, KSIZE)
    yy = jnp.arange(H)[:, None]
    xx = jnp.arange(W)[None, :]
    rows = []
    for p in range(2):
        for dy in range(KSIZE):
            sy = dy - PAD
            for dx in range(KSIZE):
                sx = dx - PAD
                valid = ((yy + sy >= 0) & (yy + sy < H) &
                         (xx + sx >= 0) & (xx + sx < W))
                rows.append(
                    (w[p, dy, dx] * valid.astype(jnp.float32)).reshape(H * W))
    return jnp.stack(rows, axis=0)                  # (2*49, H*W)


def _vmem_limit_bytes():
    """Generation-aware scoped-VMEM limit (≈48 MiB on v7x, ≈96 MiB v5e/v6e)."""
    phys = 64 * 1024 * 1024                         # conservative default (v7x)
    try:
        info = pltpu.get_tpu_info()
        phys = int(getattr(info, "vmem_capacity_bytes", phys))
    except Exception:
        pass
    return max(16 * 1024 * 1024, min((phys * 3) // 4, 96 * 1024 * 1024))


def _pick_batch_block(N, per_n_bytes, budget_bytes):
    """Largest divisor of N whose pipelined block fits the budget.

    Grows to N when it fits (single grid step: no per-step overhead on 1-TC
    parts).  If several steps remain, prefer an even step count (keeps both
    TensorCores of a 2-TC part busy) without shrinking the block >2x.
    """
    best = 1
    for d in range(1, N + 1):
        if N % d == 0 and d * per_n_bytes <= budget_bytes:
            best = d
    steps = N // best
    if steps > 1 and steps % 2 == 1:
        for d in range(best, 0, -1):
            if N % d == 0 and (N // d) % 2 == 0 and 2 * d >= best:
                best = d
                break
    return best


@jax.jit
def spa_forward(x, weight):
    """x: (N, C, H, W) f32; weight: (1, 2, 7, 7) f32 (Conv2d(2,1,7,bias=False))."""
    N, C, H, W = x.shape
    HW = H * W

    xf = x.reshape(N, C, HW).astype(jnp.float32)    # lane-dense layout

    vmem_limit = _vmem_limit_bytes()
    headroom = 2 * 1024 * 1024
    per_n = 4 * C * HW * 4                          # in + out, double-buffered

    # Resident band matrices (2 x bf16 (2*HW, HW), budgeted double-buffered).
    k_vmem = 2 * 2 * (2 * HW) * HW * 2
    use_mxu = k_vmem + headroom + per_n <= vmem_limit

    if use_mxu:
        K = _conv_band_matrix(weight, H, W)         # (2*HW, HW) f32
        k_hi = K.astype(jnp.bfloat16)
        k_lo = (K - k_hi.astype(jnp.float32)).astype(jnp.bfloat16)

        block_budget = vmem_limit - k_vmem - headroom
        nb = _pick_batch_block(N, per_n, block_budget)

        out = pl.pallas_call(
            _spa_mxu_kernel,
            out_shape=jax.ShapeDtypeStruct((N, C, HW), jnp.float32),
            grid_spec=pltpu.PrefetchScalarGridSpec(
                num_scalar_prefetch=0,
                grid=(N // nb,),
                in_specs=[
                    # band matrices: same block every step -> stay resident
                    pl.BlockSpec((2 * HW, HW), lambda n: (0, 0)),
                    pl.BlockSpec((2 * HW, HW), lambda n: (0, 0)),
                    pl.BlockSpec((nb, C, HW), lambda n: (n, 0, 0)),
                ],
                out_specs=pl.BlockSpec((nb, C, HW), lambda n: (n, 0, 0)),
            ),
            compiler_params=pltpu.CompilerParams(
                dimension_semantics=("parallel",),
                vmem_limit_bytes=vmem_limit,
            ),
        )(k_hi, k_lo, xf)
    else:
        # TODO(synk): for HW too large even for the roll path's weight slab,
        # a K-column-tiled matmul grid would be needed.
        wm = _tap_weight_planes(weight, H, W)
        wm_vmem = 2 * 2 * NTAPS * HW * 4
        block_budget = max(vmem_limit - wm_vmem - headroom, 1 << 20)
        nb = _pick_batch_block(N, per_n, block_budget)

        kernel = functools.partial(_spa_roll_kernel, W=W, HW=HW)
        out = pl.pallas_call(
            kernel,
            out_shape=jax.ShapeDtypeStruct((N, C, HW), jnp.float32),
            grid_spec=pltpu.PrefetchScalarGridSpec(
                num_scalar_prefetch=0,
                grid=(N // nb,),
                in_specs=[
                    pl.BlockSpec((2 * NTAPS, HW), lambda n: (0, 0)),
                    pl.BlockSpec((nb, C, HW), lambda n: (n, 0, 0)),
                ],
                out_specs=pl.BlockSpec((nb, C, HW), lambda n: (n, 0, 0)),
            ),
            compiler_params=pltpu.CompilerParams(
                dimension_semantics=("parallel",),
                vmem_limit_bytes=vmem_limit,
            ),
        )(wm, xf)

    return out.reshape(N, C, H, W)


def spa_reference(x, weight):
    """Pure-JAX reference matching the PyTorch forward."""
    avg = jnp.mean(x, axis=1, keepdims=True)
    mx = jnp.max(x, axis=1, keepdims=True)
    sp = jnp.concatenate([avg, mx], axis=1)                 # (N, 2, H, W)
    conv = lax.conv_general_dilated(
        sp, weight, window_strides=(1, 1),
        padding=((PAD, PAD), (PAD, PAD)),
        dimension_numbers=("NCHW", "OIHW", "NCHW"),
        precision=lax.Precision.HIGHEST)
    return x * jax.nn.sigmoid(conv)                         # broadcast (N,1,H,W)


if __name__ == "__main__":
    key = jax.random.PRNGKey(0)
    kx, kw = jax.random.split(key)

    N, C, H, W = 2, 4, 16, 16
    x = jax.random.normal(kx, (N, C, H, W), dtype=jnp.float32)
    # Deterministic synthetic conv weights (nn.Conv2d(2, 1, 7, bias=False))
    weight = (jax.random.normal(kw, (1, 2, KSIZE, KSIZE), dtype=jnp.float32)
              * 0.1)

    out = spa_forward(x, weight)
    jax.block_until_ready(out)

    ref = spa_reference(x, weight)
    assert out.shape == (N, C, H, W)
    # Tolerance covers the bf16 hi/lo split matmul (error ~1e-5) on all gens.
    assert jnp.allclose(out, ref, atol=1e-4, rtol=1e-4), (
        float(jnp.max(jnp.abs(out - ref))))

    print("KERNEL_OK")
</pallas_src>

<mosaic_0001>
module attributes {stable_mosaic.version = 11 : i64} {
  func.func @_spa_mxu_kernel(%arg0: i32, %arg1: memref<512x256xbf16, #tpu.memory_space<vmem>>, %arg2: memref<512x256xbf16, #tpu.memory_space<vmem>>, %arg3: memref<2x4x256xf32, #tpu.memory_space<vmem>>, %arg4: memref<2x4x256xf32, #tpu.memory_space<vmem>>) attributes {dimension_semantics = [#tpu.dimension_semantics<parallel>], iteration_bounds = array<i64: 1>, scalar_prefetch = 0 : i64, scratch_operands = 0 : i64, tpu.core_type = #tpu.core_type<tc>, window_params = [{pipeline_mode = #tpu.pipeline_mode<synchronous>, transform_indices = @transform_0, window_bounds = array<i64: 512, 256>}, {pipeline_mode = #tpu.pipeline_mode<synchronous>, transform_indices = @transform_1, window_bounds = array<i64: 512, 256>}, {transform_indices = @transform_2, window_bounds = array<i64: 2, 4, 256>}, {transform_indices = @transform_3, window_bounds = array<i64: 2, 4, 256>}]} {
    %c0 = arith.constant 0 : index
    %c0_0 = arith.constant 0 : index
    %c0_1 = arith.constant 0 : index
    %0 = vector.load %arg3[%c0, %c0_0, %c0_1] : memref<2x4x256xf32, #tpu.memory_space<vmem>>, vector<2x4x256xf32>
    %cst = arith.constant dense<0.000000e+00> : vector<2x256xf32>
    %1 = vector.multi_reduction <add>, %0, %cst [1] : vector<2x4x256xf32> to vector<2x256xf32>
    %cst_2 = arith.constant 4.000000e+00 : f32
    %2 = vector.broadcast %cst_2 : f32 to vector<2x256xf32>
    %3 = arith.divf %1, %2 : vector<2x256xf32>
    %cst_3 = arith.constant dense<0xFF800000> : vector<2x256xf32>
    %4 = vector.multi_reduction <maximumf>, %0, %cst_3 [1] : vector<2x4x256xf32> to vector<2x256xf32>
    %5 = tpu.concatenate %3, %4 in 1 : vector<2x256xf32>, vector<2x256xf32> -> vector<2x512xf32>
    %6 = arith.truncf %5 : vector<2x512xf32> to vector<2x512xbf16>
    %7 = arith.extf %6 : vector<2x512xbf16> to vector<2x512xf32>
    %8 = arith.subf %5, %7 : vector<2x512xf32>
    %9 = arith.truncf %8 : vector<2x512xf32> to vector<2x512xbf16>
    %c0_4 = arith.constant 0 : index
    %c0_5 = arith.constant 0 : index
    %10 = vector.load %arg1[%c0_4, %c0_5] : memref<512x256xbf16, #tpu.memory_space<vmem>>, vector<512x256xbf16>
    %c0_6 = arith.constant 0 : index
    %c0_7 = arith.constant 0 : index
    %11 = vector.load %arg2[%c0_6, %c0_7] : memref<512x256xbf16, #tpu.memory_space<vmem>>, vector<512x256xbf16>
    %cst_8 = arith.constant dense<0.000000e+00> : vector<2x256xf32>
    %12 = tpu.matmul %6, %10, %cst_8 {dimension_numbers = #tpu.dot_dimension_numbers<[1], [0], [0], [1], [0, 0, 1, 1], [], []>} : vector<2x512xbf16>, vector<512x256xbf16>, vector<2x256xf32> -> vector<2x256xf32>
    %cst_9 = arith.constant dense<0.000000e+00> : vector<2x256xf32>
    %13 = tpu.matmul %6, %11, %cst_9 {dimension_numbers = #tpu.dot_dimension_numbers<[1], [0], [0], [1], [0, 0, 1, 1], [], []>} : vector<2x512xbf16>, vector<512x256xbf16>, vector<2x256xf32> -> vector<2x256xf32>
    %14 = arith.addf %12, %13 : vector<2x256xf32>
    %cst_10 = arith.constant dense<0.000000e+00> : vector<2x256xf32>
    %15 = tpu.matmul %9, %10, %cst_10 {dimension_numbers = #tpu.dot_dimension_numbers<[1], [0], [0], [1], [0, 0, 1, 1], [], []>} : vector<2x512xbf16>, vector<512x256xbf16>, vector<2x256xf32> -> vector<2x256xf32>
    %16 = arith.addf %14, %15 : vector<2x256xf32>
    %17 = arith.negf %16 : vector<2x256xf32>
    %18 = math.exp %17 : vector<2x256xf32>
    %cst_11 = arith.constant 1.000000e+00 : f32
    %19 = vector.broadcast %cst_11 : f32 to vector<2x256xf32>
    %20 = arith.addf %19, %18 : vector<2x256xf32>
    %21 = arith.divf %19, %20 : vector<2x256xf32>
    %c0_12 = arith.constant 0 : index
    %c0_13 = arith.constant 0 : index
    %c0_14 = arith.constant 0 : index
    %22 = vector.load %arg3[%c0_12, %c0_13, %c0_14] : memref<2x4x256xf32, #tpu.memory_space<vmem>>, vector<2x4x256xf32>
    %23 = vector.shape_cast %21 : vector<2x256xf32> to vector<2x1x256xf32>
    %24 = vector.broadcast %23 : vector<2x1x256xf32> to vector<2x4x256xf32>
    %25 = arith.mulf %22, %24 : vector<2x4x256xf32>
    %c0_15 = arith.constant 0 : index
    %c0_16 = arith.constant 0 : index
    %c0_17 = arith.constant 0 : index
    %26 = vector.load %arg4[%c0_15, %c0_16, %c0_17] : memref<2x4x256xf32, #tpu.memory_space<vmem>>, vector<2x4x256xf32>
    tpu.vector_store %arg4[%c0_15, %c0_16, %c0_17], %25 {strides = array<i32>} : memref<2x4x256xf32, #tpu.memory_space<vmem>>, vector<2x4x256xf32>,
    return
  }
  func.func @transform_0(%arg0: i32) -> (i32, i32) {
    %c0_i32 = arith.constant 0 : i32
    %c0_i32_0 = arith.constant 0 : i32
    %c0_i32_1 = arith.constant 0 : i32
    return %c0_i32, %c0_i32_0 : i32, i32
  }
  func.func @transform_1(%arg0: i32) -> (i32, i32) {
    %c0_i32 = arith.constant 0 : i32
    %c0_i32_0 = arith.constant 0 : i32
    %c0_i32_1 = arith.constant 0 : i32
    return %c0_i32, %c0_i32_0 : i32, i32
  }
  func.func @transform_2(%arg0: i32) -> (i32, i32, i32) {
    %c0_i32 = arith.constant 0 : i32
    %c0_i32_0 = arith.constant 0 : i32
    %c0_i32_1 = arith.constant 0 : i32
    return %arg0, %c0_i32, %c0_i32_0 : i32, i32, i32
  }
  func.func @transform_3(%arg0: i32) -> (i32, i32, i32) {
    %c0_i32 = arith.constant 0 : i32
    %c0_i32_0 = arith.constant 0 : i32
    %c0_i32_1 = arith.constant 0 : i32
    return %arg0, %c0_i32, %c0_i32_0 : i32, i32, i32
  }
}

</mosaic_0001>

<bundles_post_ra>
// kernel: spa_forward.1
= control target key start
LH: loop header
LB: loop body
LE: loop exit
PB: predicated region body
PF: predicated region fallthrough
CT: control target
= control target key end

     0   :  { %vm22_vm0 = vcmask 1043456   ;;  %vm88_vm1 = vcmask 1041409   ;;  %s2258_s1 = inlined_call_operand.vmem [shape: bf16[512,256], index: 1, kind: input, shape index: {}]   ;;  %s2259_s2 = inlined_call_operand.vmem [shape: f32[2,4,256], index: 2, kind: input, shape index: {}]   ;;  %s2260_s0 = inlined_call_operand.vmem [shape: bf16[512,256], index: 0, kind: input, shape index: {}]   ;;  %s2261_s3 = inlined_call_operand.vmem [shape: f32[2,4,256], index: 3, kind: output, shape index: {}]  }
   0x1   :  { %v1329_v0 = vld [vmem:[%s2258_s1 + $0x74] ss:$8 sps:$4 sm:$0xff]   ;;  %v1333_v2 = vld [vmem:[%s2258_s1 + $0x70] ss:$8 sps:$4 sm:$0xff]   ;;  %v1335_v4 = vld [vmem:[%s2258_s1 + $0x64] ss:$8 sps:$4 sm:$0xff]  }
   0x2   :  { %v1331_v1 = vld [vmem:[%s2258_s1 + $0x174] ss:$8 sps:$4 sm:$0xff]   ;;  %565 = vmatprep.subr.bf16.mxu0 %v1329_v0  ;;  %v1334_v3 = vld [vmem:[%s2258_s1 + $0x170] ss:$8 sps:$4 sm:$0xff]   ;;  %v1337_v5 = vld [vmem:[%s2258_s1 + $0x164] ss:$8 sps:$4 sm:$0xff]  }
   0x3   :  { %606 = vmatprep.subr.bf16.mxu1 %v1331_v1  ;;  %566 = vmatpush1.bf16.msra.mxu0 %v1333_v2  ;;  %v1339_v6 = vld [vmem:[%s2258_s1 + $0x60] ss:$8 sps:$4 sm:$0xff]   ;;  %v1341_v8 = vld [vmem:[%s2258_s1 + $0x54] ss:$8 sps:$4 sm:$0xff]   ;;  %v1345_v10 = vld [vmem:[%s2258_s1 + $0x50] ss:$8 sps:$4 sm:$0xff]  }
   0x4   :  { %607 = vmatpush1.bf16.msra.mxu1 %v1334_v3  ;;  %567 = vmatprep.subr.bf16.mxu0 %v1335_v4  ;;  %v1340_v7 = vld [vmem:[%s2258_s1 + $0x160] ss:$8 sps:$4 sm:$0xff]   ;;  %v1343_v9 = vld [vmem:[%s2258_s1 + $0x154] ss:$8 sps:$4 sm:$0xff]   ;;  %v1346_v11 = vld [vmem:[%s2258_s1 + $0x150] ss:$8 sps:$4 sm:$0xff]  }
   0x5   :  { %608 = vmatprep.subr.bf16.mxu1 %v1337_v5  ;;  %v1347_v12 = vld [vmem:[%s2258_s1 + $0x44] ss:$8 sps:$4 sm:$0xff]   ;;  %v1351_v14 = vld [vmem:[%s2258_s1 + $0x40] ss:$8 sps:$4 sm:$0xff]   ;;  %v1353_v16 = vld [vmem:[%s2258_s1 + $0x34] ss:$8 sps:$4 sm:$0xff]  }
   0x6   :  { %v1349_v13 = vld [vmem:[%s2258_s1 + $0x144] ss:$8 sps:$4 sm:$0xff]   ;;  %v1352_v15 = vld [vmem:[%s2258_s1 + $0x140] ss:$8 sps:$4 sm:$0xff]   ;;  %v1355_v17 = vld [vmem:[%s2258_s1 + $0x134] ss:$8 sps:$4 sm:$0xff]  }
   0x7   :  { %568 = vmatpush1.bf16.msra.mxu0 %v1339_v6  ;;  %v1357_v18 = vld [vmem:[%s2258_s1 + $0x30] ss:$8 sps:$4 sm:$0xff]   ;;  %v1359_v20 = vld [vmem:[%s2258_s1 + $0x24] ss:$8 sps:$4 sm:$0xff]   ;;  %v1363_v22 = vld [vmem:[%s2258_s1 + $0x20] ss:$8 sps:$4 sm:$0xff]  }
   0x8   :  { %609 = vmatpush1.bf16.msra.mxu1 %v1340_v7  ;;  %569 = vmatprep.subr.bf16.mxu0 %v1341_v8  ;;  %v1358_v19 = vld [vmem:[%s2258_s1 + $0x130] ss:$8 sps:$4 sm:$0xff]   ;;  %v1361_v21 = vld [vmem:[%s2258_s1 + $0x124] ss:$8 sps:$4 sm:$0xff]   ;;  %v1364_v23 = vld [vmem:[%s2258_s1 + $0x120] ss:$8 sps:$4 sm:$0xff]  }
   0x9   :  { %610 = vmatprep.subr.bf16.mxu1 %v1343_v9  ;;  %v1365_v24 = vld [vmem:[%s2258_s1 + $0x14] ss:$8 sps:$4 sm:$0xff]   ;;  %v1369_v26 = vld [vmem:[%s2258_s1 + $0x10] ss:$8 sps:$4 sm:$0xff]   ;;  %v1371_v28 = vld [vmem:[%s2258_s1 + $0x4] ss:$8 sps:$4 sm:$0xff]  }
   0xa   :  { %v1367_v25 = vld [vmem:[%s2258_s1 + $0x114] ss:$8 sps:$4 sm:$0xff]   ;;  %v1370_v27 = vld [vmem:[%s2258_s1 + $0x110] ss:$8 sps:$4 sm:$0xff]   ;;  %v1373_v29 = vld [vmem:[%s2258_s1 + $0x104] ss:$8 sps:$4 sm:$0xff]  }
   0xb   :  { %570 = vmatpush1.bf16.msra.mxu0 %v1345_v10  ;;  %v1375_v30 = vld [vmem:[%s2258_s1] ss:$8 sps:$4 sm:$0xff]   ;;  %v1377_v32 = vld [vmem:[%s2258_s1 + $0xf4] ss:$8 sps:$4 sm:$0xff]   ;;  %v1381_v34 = vld [vmem:[%s2258_s1 + $0xf0] ss:$8 sps:$4 sm:$0xff]  }
   0xc   :  { %611 = vmatpush1.bf16.msra.mxu1 %v1346_v11  ;;  %571 = vmatprep.subr.bf16.mxu0 %v1347_v12  ;;  %v1376_v31 = vld [vmem:[%s2258_s1 + $0x100] ss:$8 sps:$4 sm:$0xff]   ;;  %v1379_v33 = vld [vmem:[%s2258_s1 + $0x1f4] ss:$8 sps:$4 sm:$0xff]   ;;  %v1382_v35 = vld [vmem:[%s2258_s1 + $0x1f0] ss:$8 sps:$4 sm:$0xff]  }
   0xd   :  { %612 = vmatprep.subr.bf16.mxu1 %v1349_v13  ;;  %v1383_v36 = vld [vmem:[%s2258_s1 + $0xe4] ss:$8 sps:$4 sm:$0xff]   ;;  %v1387_v38 = vld [vmem:[%s2258_s1 + $0xe0] ss:$8 sps:$4 sm:$0xff]   ;;  %v1389_v40 = vld [vmem:[%s2258_s1 + $0xd4] ss:$8 sps:$4 sm:$0xff]  }
   0xe   :  { %v1385_v37 = vld [vmem:[%s2258_s1 + $0x1e4] ss:$8 sps:$4 sm:$0xff]   ;;  %v1388_v39 = vld [vmem:[%s2258_s1 + $0x1e0] ss:$8 sps:$4 sm:$0xff]   ;;  %v1391_v41 = vld [vmem:[%s2258_s1 + $0x1d4] ss:$8 sps:$4 sm:$0xff]  }
   0xf   :  { %572 = vmatpush1.bf16.msra.mxu0 %v1351_v14  ;;  %v1393_v42 = vld [vmem:[%s2258_s1 + $0xd0] ss:$8 sps:$4 sm:$0xff]   ;;  %v1395_v44 = vld [vmem:[%s2258_s1 + $0xc4] ss:$8 sps:$4 sm:$0xff]   ;;  %v1399_v46 = vld [vmem:[%s2258_s1 + $0xc0] ss:$8 sps:$4 sm:$0xff]  }
  0x10   :  { %613 = vmatpush1.bf16.msra.mxu1 %v1352_v15  ;;  %573 = vmatprep.subr.bf16.mxu0 %v1353_v16  ;;  %v1394_v43 = vld [vmem:[%s2258_s1 + $0x1d0] ss:$8 sps:$4 sm:$0xff]   ;;  %v1397_v45 = vld [vmem:[%s2258_s1 + $0x1c4] ss:$8 sps:$4 sm:$0xff]   ;;  %v1400_v47 = vld [vmem:[%s2258_s1 + $0x1c0] ss:$8 sps:$4 sm:$0xff]  }
  0x11   :  { %614 = vmatprep.subr.bf16.mxu1 %v1355_v17  ;;  %v1699_v48 = vld [vmem:[%s2259_s2] sm:$0xff]  ;;  %v1704_v49 = vld [vmem:[%s2259_s2 + $0x8] sm:$0xff]  ;;  %v1401_v53 = vld [vmem:[%s2258_s1 + $0xb4] ss:$8 sps:$4 sm:$0xff]  }
  0x12   :  { %2272 = vst [vmem:[#allocation2_spill] sm:$0xff] %v1699_v48  ;;  %2273 = vst [vmem:[#allocation3_spill] sm:$0xff] %v1704_v49  ;;  %v18_v50 = vcombine.high %v1699_v48, %v1699_v48  ;;  %v23_v51 = vsel %vm22_vm0, %v1699_v48, 0.0  ;;  %v56_v52 = vsel %vm22_vm0, %v1699_v48, -inf  ;;  %v19_v54 = vcombine.high %v1704_v49, %v1704_v49  ;;  %v1403_v58 = vld [vmem:[%s2258_s1 + $0x1b4] ss:$8 sps:$4 sm:$0xff]  }
  0x13   :  { %574 = vmatpush1.bf16.msra.mxu0 %v1357_v18  ;;  %v24_v55 = vrot.slane %v23_v51, 4  ;;  %v37_v56 = vsel %vm22_vm0, %v1704_v49, 0.0  ;;  %v57_v57 = vrot.slane %v56_v52, 4  ;;  %v70_v62 = vsel %vm22_vm0, %v1704_v49, -inf  ;;  %v1405_v3 = vld [vmem:[%s2258_s1 + $0xb0] ss:$8 sps:$4 sm:$0xff]  }
  0x14   :  { %615 = vmatpush1.bf16.msra.mxu1 %v1358_v19  ;;  %575 = vmatprep.subr.bf16.mxu0 %v1359_v20  ;;  %v30_v59 = vsel %vm22_vm0, %v18_v50, 0.0  ;;  %v63_v60 = vsel %vm22_vm0, %v18_v50, -inf  ;;  %v38_v61 = vrot.slane %v37_v56, 4  ;;  %v44_v0 = vsel %vm22_vm0, %v19_v54, 0.0  ;;  %v1406_v8 = vld [vmem:[%s2258_s1 + $0x1b0] ss:$8 sps:$4 sm:$0xff]  }
  0x15   :  { %616 = vmatprep.subr.bf16.mxu1 %v1361_v21  ;;  %v31_v63 = vrot.slane %v30_v59, 4  ;;  %v64_v1 = vrot.slane %v63_v60, 4  ;;  %v77_v2 = vsel %vm22_vm0, %v19_v54, -inf  ;;  %v45_v4 = vrot.slane %v44_v0, 4  ;;  %v1407_v9 = vld [vmem:[%s2258_s1 + $0xa4] ss:$8 sps:$4 sm:$0xff]  }
  0x16   :  { %v78_v5 = vrot.slane %v77_v2, 4  ;;  %v25_v6 = vadd.f32 %v24_v55, %v23_v51  ;;  %v39_v7 = vadd.f32 %v38_v61, %v37_v56  ;;  %v58_v12 = vmax.f32 %v56_v52, %v57_v57  ;;  %v1409_v14 = vld [vmem:[%s2258_s1 + $0x1a4] ss:$8 sps:$4 sm:$0xff]   ;;  %v1418_v50 = vld [vmem:[%s2258_s1 + $0x190] ss:$8 sps:$4 sm:$0xff]  }
  0x17   :  { %576 = vmatpush1.bf16.msra.mxu0 %v1363_v22  ;;  %v32_v10 = vadd.f32 %v31_v63, %v30_v59  ;;  %v65_v11 = vmax.f32 %v63_v60, %v64_v1  ;;  %v71_v13 = vrot.slane %v70_v62, 4  ;;  %v46_v15 = vadd.f32 %v45_v4, %v44_v0  ;;  %v1419_v55 = vld [vmem:[%s2258_s1 + $0x84] ss:$8 sps:$4 sm:$0xff]   ;;  %v1423_v1 = vld [vmem:[%s2258_s1 + $0x80] ss:$8 sps:$4 sm:$0xff]  }
  0x18   :  { %617 = vmatpush1.bf16.msra.mxu1 %v1364_v23  ;;  %577 = vmatprep.subr.bf16.mxu0 %v1365_v24  ;;  %v79_v16 = vmax.f32 %v77_v2, %v78_v5  ;;  %v26_v17 = vrot.slane %v25_v6, 2  ;;  %v40_v18 = vrot.slane %v39_v7, 2  ;;  %v59_v21 = vrot.slane %v58_v12, 2  ;;  %v1411_v23 = vld [vmem:[%s2258_s1 + $0xa0] ss:$8 sps:$4 sm:$0xff]  }
  0x19   :  { %618 = vmatprep.subr.bf16.mxu1 %v1367_v25  ;;  %v33_v19 = vrot.slane %v32_v10, 2  ;;  %v66_v20 = vrot.slane %v65_v11, 2  ;;  %v72_v22 = vmax.f32 %v70_v62, %v71_v13  ;;  %v47_v24 = vrot.slane %v46_v15, 2  ;;  %v1421_v56 = vld [vmem:[%s2258_s1 + $0x184] ss:$8 sps:$4 sm:$0xff]  }
  0x1a   :  { %v80_v25 = vrot.slane %v79_v16, 2  ;;  %v1424_v2 = vld [vmem:[%s2258_s1 + $0x180] ss:$8 sps:$4 sm:$0xff]   ;;  %v1799_v13 = vld [vmem:[%s2260_s0 + $0x70] ss:$8 sps:$4 sm:$0xff]  }
  0x1b   :  { %578 = vmatpush1.bf16.msra.mxu0 %v1369_v26  ;;  %v27_v26 = vadd.f32 %v26_v17, %v25_v6  ;;  %v1812_v17 = vld [vmem:[%s2260_s0 + $0x64] ss:$8 sps:$4 sm:$0xff]   ;;  %v2129_v49 = vld [vmem:[%s2260_s0 + $0x94] ss:$8 sps:$4 sm:$0xff]  }
  0x1c   :  { %619 = vmatpush1.bf16.msra.mxu1 %v1370_v27  ;;  %579 = vmatprep.subr.bf16.mxu0 %v1371_v28  ;;  %v41_v27 = vadd.f32 %v40_v18, %v39_v7  ;;  %v1412_v28 = vld [vmem:[%s2258_s1 + $0x1a0] ss:$8 sps:$4 sm:$0xff]   ;;  %v1781_v7 = vld [vmem:[%s2260_s0 + $0x74] ss:$8 sps:$4 sm:$0xff]   ;;  %v1817_v18 = vld [vmem:[%s2260_s0 + $0x164] ss:$8 sps:$4 sm:$0xff]  }
  0x1d   :  { %620 = vmatprep.subr.bf16.mxu1 %v1373_v29  ;;  %v1413_v29 = vld [vmem:[%s2258_s1 + $0x94] ss:$8 sps:$4 sm:$0xff]   ;;  %2278 = vst [vmem:[#allocation8_spill] sm:$0xff] %v2129_v49 }
  0x1e   :  { %v2134_v48 = vld [vmem:[%s2260_s0 + $0x194] ss:$8 sps:$4 sm:$0xff]  }
  0x1f   :  { %580 = vmatpush1.bf16.msra.mxu0 %v1375_v30  ;;  %v34_v30 = vadd.f32 %v33_v19, %v32_v10  ;;  %2279 = vst [vmem:[#allocation9_spill] sm:$0xff] %v2134_v48 }
  0x20   :  { %621 = vmatpush1.bf16.msra.mxu1 %v1376_v31  ;;  %581 = vmatprep.subr.bf16.mxu0 %v1377_v32  ;;  %v67_v31 = vmax.f32 %v65_v11, %v66_v20  ;;  %v60_v32 = vmax.f32 %v58_v12, %v59_v21  ;;  %v1829_v20 = vld [vmem:[%s2260_s0 + $0x60] ss:$8 sps:$4 sm:$0xff]  }
  0x21   :  { %622 = vmatprep.subr.bf16.mxu1 %v1379_v33  ;;  %v73_v33 = vrot.slane %v72_v22, 2  ;;  %v1834_v21 = vld [vmem:[%s2260_s0 + $0x160] ss:$8 sps:$4 sm:$0xff]  }
  0x23   :  { %582 = vmatpush2.bf16.msra.mxu0 %v1381_v34  ;;  %v1415_v34 = vld [vmem:[%s2258_s1 + $0x194] ss:$8 sps:$4 sm:$0xff]  }
  0x24   :  { %623 = vmatpush2.bf16.msra.mxu1 %v1382_v35  ;;  %583 = vmatprep.subr.bf16.mxu0 %v1383_v36  ;;  %v48_v35 = vadd.f32 %v47_v24, %v46_v15  ;;  %v81_v36 = vmax.f32 %v79_v16, %v80_v25  ;;  %v1853_v24 = vld [vmem:[%s2260_s0 + $0x50] ss:$8 sps:$4 sm:$0xff]  }
  0x25   :  { %624 = vmatprep.subr.bf16.mxu1 %v1385_v37  ;;  %v28_v37 = vrot.slane %v27_v26, 1  ;;  %v1858_v25 = vld [vmem:[%s2260_s0 + $0x150] ss:$8 sps:$4 sm:$0xff]  }
  0x27   :  { %584 = vmatpush2.bf16.msra.mxu0 %v1387_v38  ;;  %v42_v38 = vrot.slane %v41_v27, 1 }
  0x28   :  { %625 = vmatpush2.bf16.msra.mxu1 %v1388_v39  ;;  %585 = vmatprep.subr.bf16.mxu0 %v1389_v40  ;;  %v35_v39 = vrot.slane %v34_v30, 1  ;;  %v68_v40 = vrot.slane %v67_v31, 1 }
  0x29   :  { %626 = vmatprep.subr.bf16.mxu1 %v1391_v41  ;;  %v61_v41 = vrot.slane %v60_v32, 1 }
  0x2a   :  { %v36_v51 = vadd.f32 %v35_v39, %v34_v30  ;;  %v69_v52 = vmax.f32 %v67_v31, %v68_v40  ;;  %v1889_v30 = vld [vmem:[%s2260_s0 + $0x34] ss:$8 sps:$4 sm:$0xff]   ;;  %v1949_v40 = vld [vmem:[%s2260_s0 + $0x10] ss:$8 sps:$4 sm:$0xff]  }
  0x2b   :  { %586 = vmatpush2.bf16.msra.mxu0 %v1393_v42  ;;  %v74_v42 = vmax.f32 %v72_v22, %v73_v33  ;;  %v1841_v22 = vld [vmem:[%s2260_s0 + $0x54] ss:$8 sps:$4 sm:$0xff]   ;;  %v1906_v33 = vld [vmem:[%s2260_s0 + $0x130] ss:$8 sps:$4 sm:$0xff]  }
  0x2c   :  { %627 = vmatpush2.bf16.msra.mxu1 %v1394_v43  ;;  %587 = vmatprep.subr.bf16.mxu0 %v1395_v44  ;;  %v49_v43 = vrot.slane %v48_v35, 1  ;;  %v82_v44 = vrot.slane %v81_v36, 1  ;;  %v53_v61 = vmul.f32 0.25, %v36_v51  ;;  %v1894_v31 = vld [vmem:[%s2260_s0 + $0x134] ss:$8 sps:$4 sm:$0xff]  }
  0x2d   :  { %628 = vmatprep.subr.bf16.mxu1 %v1397_v45  ;;  %v29_v45 = vadd.f32 %v28_v37, %v27_v26  ;;  %v75_v54 = vrot.slane %v74_v42, 1  ;;  %v1865_v26 = vld [vmem:[%s2260_s0 + $0x44] ss:$8 sps:$4 sm:$0xff]   ;;  %v1930_v37 = vld [vmem:[%s2260_s0 + $0x120] ss:$8 sps:$4 sm:$0xff]  }
  0x2e   :  { %v50_v57 = vadd.f32 %v49_v43, %v48_v35  ;;  %v1918_v35 = vld [vmem:[%s2260_s0 + $0x124] ss:$8 sps:$4 sm:$0xff]   ;;  %v1942_v39 = vld [vmem:[%s2260_s0 + $0x114] ss:$8 sps:$4 sm:$0xff]   ;;  %v2002_v51 = vld [vmem:[%s2260_s0 + $0x1f0] ss:$8 sps:$4 sm:$0xff]  }
  0x2f   :  { %588 = vmatpush2.bf16.msra.mxu0 %v1399_v46  ;;  %v43_v46 = vadd.f32 %v42_v38, %v41_v27  ;;  %v52_v59 = vmul.f32 0.25, %v29_v45  ;;  %v76_v62 = vmax.f32 %v74_v42, %v75_v54  ;;  %v1870_v27 = vld [vmem:[%s2260_s0 + $0x144] ss:$8 sps:$4 sm:$0xff]   ;;  %v1937_v38 = vld [vmem:[%s2260_s0 + $0x14] ss:$8 sps:$4 sm:$0xff]  }
  0x30   :  { %629 = vmatpush2.bf16.msra.mxu1 %v1400_v47  ;;  %589 = vmatprep.subr.bf16.mxu0 %v1401_v53  ;;  %v1417_v47 = vld [vmem:[%s2258_s1 + $0x90] ss:$8 sps:$4 sm:$0xff]   ;;  %v62_v53 = vmax.f32 %v60_v32, %v61_v41  ;;  %v55_v63 = vmul.f32 0.25, %v50_v57  ;;  %v1961_v42 = vld [vmem:[%s2260_s0 + $0x4] ss:$8 sps:$4 sm:$0xff]  }
  0x31   :  { %630 = vmatprep.subr.bf16.mxu1 %v1403_v58  ;;  %v83_v58 = vmax.f32 %v81_v36, %v82_v44  ;;  %v54_v60 = vmul.f32 0.25, %v43_v46  ;;  %v1901_v32 = vld [vmem:[%s2260_s0 + $0x30] ss:$8 sps:$4 sm:$0xff]   ;;  %v1925_v36 = vld [vmem:[%s2260_s0 + $0x20] ss:$8 sps:$4 sm:$0xff]  }
  0x32   :  { %v1775_v5 = vsel %vm88_vm1, %v76_v62, %v62_v53  ;;  %v90_v6 = vsel %vm88_vm1, %v55_v63, %v53_v61  ;;  %v1954_v41 = vld [vmem:[%s2260_s0 + $0x110] ss:$8 sps:$4 sm:$0xff]   ;;  %v1966_v43 = vld [vmem:[%s2260_s0 + $0x104] ss:$8 sps:$4 sm:$0xff]   ;;  %v1973_v44 = vld [vmem:[%s2260_s0] ss:$8 sps:$4 sm:$0xff]  }
  0x33   :  { %590 = vmatpush2.bf16.msra.mxu0 %v1405_v3  ;;  %v98_v0 = vsel %vm88_vm1, %v83_v58, %v69_v52  ;;  %v1772_v4 = vsel %vm88_vm1, %v54_v60, %v52_v59  ;;  %2275 = vst [vmem:[#allocation5_spill] sm:$0xff] %v1775_v5  ;;  %v1794_v12 = vpack.c.bf16 %v1775_v5, %v1775_v5  ;;  %v1978_v45 = vld [vmem:[%s2260_s0 + $0x100] ss:$8 sps:$4 sm:$0xff]   ;;  %v1985_v46 = vld [vmem:[%s2260_s0 + $0xf4] ss:$8 sps:$4 sm:$0xff]  }
  0x34   :  { %631 = vmatpush2.bf16.msra.mxu1 %v1406_v8  ;;  %591 = vmatprep.subr.bf16.mxu0 %v1407_v9  ;;  %v104_v3 = vpack.c.bf16 %v98_v0, %v98_v0  ;;  %2274 = vst [vmem:[#allocation4_spill] sm:$0xff] %v1772_v4  ;;  %v102_v8 = vpack.c.bf16 %v90_v6, %v90_v6  ;;  %v1786_v9 = vld [vmem:[%s2260_s0 + $0x174] ss:$8 sps:$4 sm:$0xff]   ;;  %v2009_v52 = vld [vmem:[%s2260_s0 + $0xe4] ss:$8 sps:$4 sm:$0xff]  }
  0x35   :  { %632 = vmatprep.subr.bf16.mxu1 %v1409_v14  ;;  %v1790_v11 = vpack.c.bf16 %v1772_v4, %v1772_v4  ;;  %v1804_v14 = vld [vmem:[%s2260_s0 + $0x170] ss:$8 sps:$4 sm:$0xff]   ;;  %v2014_v53 = vld [vmem:[%s2260_s0 + $0x1e4] ss:$8 sps:$4 sm:$0xff]   ;;  %v2021_v54 = vld [vmem:[%s2260_s0 + $0xe0] ss:$8 sps:$4 sm:$0xff]  }
  0x36   :  { %638 = vmatprep.mubr.bf16.mxu1 %v104_v3  ;;  %v108_v10 = vunpack.c.l.bf16 %v104_v3  ;;  %v106_v15 = vunpack.c.l.bf16 %v102_v8  ;;  %597 = vmatprep.mubr.bf16.mxu0 %v102_v8  ;;  %v2038_v57 = vld [vmem:[%s2260_s0 + $0x1d4] ss:$8 sps:$4 sm:$0xff]   ;;  %v2045_v58 = vld [vmem:[%s2260_s0 + $0xd0] ss:$8 sps:$4 sm:$0xff]   ;;  %v2057_v60 = vld [vmem:[%s2260_s0 + $0xc4] ss:$8 sps:$4 sm:$0xff]  }
  0x37   :  { %592 = vmatpush2.bf16.msra.mxu0 %v1411_v23  ;;  %v1846_v23 = vld [vmem:[%s2260_s0 + $0x154] ss:$8 sps:$4 sm:$0xff]   ;;  %v2050_v59 = vld [vmem:[%s2260_s0 + $0x1d0] ss:$8 sps:$4 sm:$0xff]   ;;  %v2062_v61 = vld [vmem:[%s2260_s0 + $0x1c4] ss:$8 sps:$4 sm:$0xff]  }
  0x38   :  { %633 = vmatpush2.bf16.msra.mxu1 %v1412_v28  ;;  %593 = vmatprep.subr.bf16.mxu0 %v1413_v29  ;;  %v1806_v16 = vsub.f32 %v98_v0, %v108_v10  ;;  %v1820_v19 = vsub.f32 %v90_v6, %v106_v15  ;;  %v1877_v28 = vld [vmem:[%s2260_s0 + $0x40] ss:$8 sps:$4 sm:$0xff]   ;;  %v2081_v0 = vld [vmem:[%s2260_s0 + $0xb4] ss:$8 sps:$4 sm:$0xff]   ;;  %v2105_v6 = vld [vmem:[%s2260_s0 + $0xa4] ss:$8 sps:$4 sm:$0xff]  }
  0x39   :  { %634 = vmatprep.subr.bf16.mxu1 %v1415_v34  ;;  %v1882_v29 = vld [vmem:[%s2260_s0 + $0x140] ss:$8 sps:$4 sm:$0xff]   ;;  %v1913_v34 = vld [vmem:[%s2260_s0 + $0x24] ss:$8 sps:$4 sm:$0xff]   ;;  %v2141_v5 = vld [vmem:[%s2260_s0 + $0x90] ss:$8 sps:$4 sm:$0xff]  }
  0x3a   :  { %v2069_v62 = vld [vmem:[%s2260_s0 + $0xc0] ss:$8 sps:$4 sm:$0xff]   ;;  %2280 = vst [vmem:[#allocation10_spill] sm:$0xff] %v2141_v5  ;;  %v2146_v4 = vld [vmem:[%s2260_s0 + $0x190] ss:$8 sps:$4 sm:$0xff]  }
  0x3b   :  { %594 = vmatpush2.bf16.msra.mxu0 %v1417_v47  ;;  %v1990_v47 = vld [vmem:[%s2260_s0 + $0x1f4] ss:$8 sps:$4 sm:$0xff]   ;;  %v2074_v63 = vld [vmem:[%s2260_s0 + $0x1c0] ss:$8 sps:$4 sm:$0xff]   ;;  %2281 = vst [vmem:[#allocation11_spill] sm:$0xff] %v2146_v4 }
  0x3c   :  { %635 = vmatpush2.bf16.msra.mxu1 %v1418_v50  ;;  %595 = vmatprep.subr.bf16.mxu0 %v1419_v55  ;;  %v1997_v50 = vld [vmem:[%s2260_s0 + $0xf0] ss:$8 sps:$4 sm:$0xff]   ;;  %v2026_v55 = vld [vmem:[%s2260_s0 + $0x1e0] ss:$8 sps:$4 sm:$0xff]  }
  0x3d   :  { %636 = vmatprep.subr.bf16.mxu1 %v1421_v56  ;;  %v2033_v56 = vld [vmem:[%s2260_s0 + $0xd4] ss:$8 sps:$4 sm:$0xff]   ;;  %v2117_v10 = vld [vmem:[%s2260_s0 + $0xa0] ss:$8 sps:$4 sm:$0xff]  }
  0x3e   :  { %2276 = vst [vmem:[#allocation6_spill] sm:$0xff] %v2117_v10  ;;  %v2122_v15 = vld [vmem:[%s2260_s0 + $0x1a0] ss:$8 sps:$4 sm:$0xff]  }
  0x3f   :  { %596 = vmatpush2.bf16.msra.mxu0 %v1423_v1  ;;  %v2086_v1 = vld [vmem:[%s2260_s0 + $0x1b4] ss:$8 sps:$4 sm:$0xff]   ;;  %2277 = vst [vmem:[#allocation7_spill] sm:$0xff] %v2122_v15 }
  0x40   :  { %637 = vmatpush2.bf16.msra.mxu1 %v1424_v2  ;;  %967 = vmatprep.subr.bf16.mxu0 %v1781_v7  ;;  %v2093_v2 = vld [vmem:[%s2260_s0 + $0xb0] ss:$8 sps:$4 sm:$0xff]  }
  0x41   :  { %1008 = vmatprep.subr.bf16.mxu1 %v1786_v9 }
  0x42   :  { %598 = vmatmul.mubr.bf16.vlgmr.msra.gmra.mxu0 %v1790_v11 }
  0x43   :  { %639 = vmatmul.mubr.bf16.vlgmr.msra.gmra.mxu1 %v1794_v12  ;;  %968 = vmatpush1.bf16.msra.mxu0 %v1799_v13 }
  0x44   :  { %1009 = vmatpush1.bf16.msra.mxu1 %v1804_v14  ;;  %969 = vmatprep.subr.bf16.mxu0 %v1812_v17 }
  0x45   :  { %1010 = vmatprep.subr.bf16.mxu1 %v1817_v18  ;;  %999 = vmatprep.mubr.bf16.mxu0 %v102_v8  ;;  %v2110_v8 = vld [vmem:[%s2260_s0 + $0x1a4] ss:$8 sps:$4 sm:$0xff]  }
  0x46   :  { %1040 = vmatprep.mubr.bf16.mxu1 %v104_v3  ;;  %v2098_v3 = vld [vmem:[%s2260_s0 + $0x1b0] ss:$8 sps:$4 sm:$0xff]  }
  0x47   :  { %970 = vmatpush1.bf16.msra.mxu0 %v1829_v20 }
  0x48   :  { %1011 = vmatpush1.bf16.msra.mxu1 %v1834_v21  ;;  %971 = vmatprep.subr.bf16.mxu0 %v1841_v22 }
  0x49   :  { %1012 = vmatprep.subr.bf16.mxu1 %v1846_v23 }
  0x4b   :  { %972 = vmatpush1.bf16.msra.mxu0 %v1853_v24 }
  0x4c   :  { %1013 = vmatpush1.bf16.msra.mxu1 %v1858_v25  ;;  %973 = vmatprep.subr.bf16.mxu0 %v1865_v26 }
  0x4d   :  { %1014 = vmatprep.subr.bf16.mxu1 %v1870_v27 }
  0x4f   :  { %974 = vmatpush1.bf16.msra.mxu0 %v1877_v28 }
  0x50   :  { %1015 = vmatpush1.bf16.msra.mxu1 %v1882_v29  ;;  %975 = vmatprep.subr.bf16.mxu0 %v1889_v30 }
  0x51   :  { %1016 = vmatprep.subr.bf16.mxu1 %v1894_v31 }
  0x53   :  { %976 = vmatpush1.bf16.msra.mxu0 %v1901_v32 }
  0x54   :  { %1017 = vmatpush1.bf16.msra.mxu1 %v1906_v33  ;;  %977 = vmatprep.subr.bf16.mxu0 %v1913_v34 }
  0x55   :  { %1018 = vmatprep.subr.bf16.mxu1 %v1918_v35 }
  0x57   :  { %978 = vmatpush1.bf16.msra.mxu0 %v1925_v36 }
  0x58   :  { %1019 = vmatpush1.bf16.msra.mxu1 %v1930_v37  ;;  %979 = vmatprep.subr.bf16.mxu0 %v1937_v38 }
  0x59   :  { %1020 = vmatprep.subr.bf16.mxu1 %v1942_v39 }
  0x5b   :  { %980 = vmatpush1.bf16.msra.mxu0 %v1949_v40 }
  0x5c   :  { %1021 = vmatpush1.bf16.msra.mxu1 %v1954_v41  ;;  %981 = vmatprep.subr.bf16.mxu0 %v1961_v42 }
  0x5d   :  { %1022 = vmatprep.subr.bf16.mxu1 %v1966_v43 }
  0x5f   :  { %982 = vmatpush1.bf16.msra.mxu0 %v1973_v44 }
  0x60   :  { %1023 = vmatpush1.bf16.msra.mxu1 %v1978_v45  ;;  %983 = vmatprep.subr.bf16.mxu0 %v1985_v46 }
  0x61   :  { %1024 = vmatprep.subr.bf16.mxu1 %v1990_v47 }
  0x63   :  { %984 = vmatpush2.bf16.msra.mxu0 %v1997_v50 }
  0x64   :  { %1025 = vmatpush2.bf16.msra.mxu1 %v2002_v51  ;;  %985 = vmatprep.subr.bf16.mxu0 %v2009_v52 }
  0x65   :  { %1026 = vmatprep.subr.bf16.mxu1 %v2014_v53 }
  0x67   :  { %986 = vmatpush2.bf16.msra.mxu0 %v2021_v54 }
  0x68   :  { %1027 = vmatpush2.bf16.msra.mxu1 %v2026_v55  ;;  %987 = vmatprep.subr.bf16.mxu0 %v2033_v56 }
  0x69   :  { %1028 = vmatprep.subr.bf16.mxu1 %v2038_v57 }
  0x6b   :  { %988 = vmatpush2.bf16.msra.mxu0 %v2045_v58 }
  0x6c   :  { %1029 = vmatpush2.bf16.msra.mxu1 %v2050_v59  ;;  %989 = vmatprep.subr.bf16.mxu0 %v2057_v60 }
  0x6d   :  { %1030 = vmatprep.subr.bf16.mxu1 %v2062_v61 }
  0x6f   :  { %990 = vmatpush2.bf16.msra.mxu0 %v2069_v62 }
  0x70   :  { %1031 = vmatpush2.bf16.msra.mxu1 %v2074_v63  ;;  %991 = vmatprep.subr.bf16.mxu0 %v2081_v0 }
  0x71   :  { %1032 = vmatprep.subr.bf16.mxu1 %v2086_v1 }
  0x73   :  { %992 = vmatpush2.bf16.msra.mxu0 %v2093_v2 }
  0x74   :  { %1033 = vmatpush2.bf16.msra.mxu1 %v2098_v3  ;;  %993 = vmatprep.subr.bf16.mxu0 %v2105_v6 }
  0x75   :  { %1034 = vmatprep.subr.bf16.mxu1 %v2110_v8 }
  0x77   :  { %994 = vmatpush2.bf16.msra.mxu0 %v2117_v10  ;;  %v2153_v10 = vld [vmem:[%s2260_s0 + $0x84] ss:$8 sps:$4 sm:$0xff]  }
  0x78   :  { %1035 = vmatpush2.bf16.msra.mxu1 %v2122_v15  ;;  %995 = vmatprep.subr.bf16.mxu0 %v2129_v49  ;;  %v2158_v15 = vld [vmem:[%s2260_s0 + $0x184] ss:$8 sps:$4 sm:$0xff]   ;;  %v2165_v49 = vld [vmem:[%s2260_s0 + $0x80] ss:$8 sps:$4 sm:$0xff]  }
  0x79   :  { %1036 = vmatprep.subr.bf16.mxu1 %v2134_v48  ;;  %v2170_v48 = vld [vmem:[%s2260_s0 + $0x180] ss:$8 sps:$4 sm:$0xff]  }
  0x7b   :  { %996 = vmatpush2.bf16.msra.mxu0 %v2141_v5  ;;  %v116_v5 = vpack.c.bf16 %v1806_v16, %v1806_v16  ;;  %v2286_v16 = vld [vmem:[#allocation4_spill] sm:$0xff] }
  0x7c   :  { %1037 = vmatpush2.bf16.msra.mxu1 %v2146_v4  ;;  %997 = vmatprep.subr.bf16.mxu0 %v2153_v10  ;;  %v114_v4 = vpack.c.bf16 %v1820_v19, %v1820_v19 }
  0x7d   :  { %1038 = vmatprep.subr.bf16.mxu1 %v2158_v15 }
  0x7f   :  { %998 = vmatpush2.bf16.msra.mxu0 %v2165_v49 }
  0x80   :  { %1039 = vmatpush2.bf16.msra.mxu1 %v2170_v48  ;;  %1049 = vmatprep.subr.bf16.mxu0 %v1781_v7  ;;  %v2282_v7 = vld [vmem:[#allocation6_spill] sm:$0xff] }
  0x81   :  { %1090 = vmatprep.subr.bf16.mxu1 %v1786_v9  ;;  %v2283_v9 = vld [vmem:[#allocation7_spill] sm:$0xff] }
  0x82   :  { %1000 = vmatmul.mubr.bf16.vlgmr.msra.gmra.mxu0 %v1790_v11 }
  0x83   :  { %1041 = vmatmul.mubr.bf16.vlgmr.msra.gmra.mxu1 %v1794_v12  ;;  %1050 = vmatpush1.bf16.msra.mxu0 %v1799_v13  ;;  %v2284_v13 = vld [vmem:[#allocation8_spill] sm:$0xff] }
  0x84   :  { %1091 = vmatpush1.bf16.msra.mxu1 %v1804_v14  ;;  %1051 = vmatprep.subr.bf16.mxu0 %v1812_v17  ;;  %v2285_v14 = vld [vmem:[#allocation9_spill] sm:$0xff] }
  0x85   :  { %1092 = vmatprep.subr.bf16.mxu1 %v1817_v18  ;;  %1081 = vmatprep.mubr.bf16.mxu0 %v114_v4  ;;  %v105_v4 = vunpack.c.l.bf16 %v1790_v11  ;;  %v2287_v18 = vld [vmem:[#allocation5_spill] sm:$0xff] }
  0x86   :  { %1122 = vmatprep.mubr.bf16.mxu1 %v116_v5  ;;  %v107_v5 = vunpack.c.l.bf16 %v1794_v12 }
  0x87   :  { %1052 = vmatpush1.bf16.msra.mxu0 %v1829_v20  ;;  %v109_v17 = vsub.f32 %v2286_v16, %v105_v4  ;;  %v2288_v20 = vld [vmem:[#allocation10_spill] sm:$0xff] }
  0x88   :  { %1093 = vmatpush1.bf16.msra.mxu1 %v1834_v21  ;;  %1053 = vmatprep.subr.bf16.mxu0 %v1841_v22  ;;  %v111_v19 = vsub.f32 %v2287_v18, %v107_v5  ;;  %v2289_v21 = vld [vmem:[#allocation11_spill] sm:$0xff] }
  0x89   :  { %1094 = vmatprep.subr.bf16.mxu1 %v1846_v23  ;;  %v113_v11 = vpack.c.bf16 %v109_v17, %v109_v17 }
  0x8a   :  { %v115_v12 = vpack.c.bf16 %v111_v19, %v111_v19 }
  0x8b   :  { %1054 = vmatpush1.bf16.msra.mxu0 %v1853_v24 }
  0x8c   :  { %1095 = vmatpush1.bf16.msra.mxu1 %v1858_v25  ;;  %1055 = vmatprep.subr.bf16.mxu0 %v1865_v26 }
  0x8d   :  { %1096 = vmatprep.subr.bf16.mxu1 %v1870_v27 }
  0x8f   :  { %1056 = vmatpush1.bf16.msra.mxu0 %v1877_v28 }
  0x90   :  { %1097 = vmatpush1.bf16.msra.mxu1 %v1882_v29  ;;  %1057 = vmatprep.subr.bf16.mxu0 %v1889_v30 }
  0x91   :  { %1098 = vmatprep.subr.bf16.mxu1 %v1894_v31 }
  0x93   :  { %1058 = vmatpush1.bf16.msra.mxu0 %v1901_v32 }
  0x94   :  { %1099 = vmatpush1.bf16.msra.mxu1 %v1906_v33  ;;  %1059 = vmatprep.subr.bf16.mxu0 %v1913_v34 }
  0x95   :  { %1100 = vmatprep.subr.bf16.mxu1 %v1918_v35 }
  0x97   :  { %1060 = vmatpush1.bf16.msra.mxu0 %v1925_v36 }
  0x98   :  { %1101 = vmatpush1.bf16.msra.mxu1 %v1930_v37  ;;  %1061 = vmatprep.subr.bf16.mxu0 %v1937_v38 }
  0x99   :  { %1102 = vmatprep.subr.bf16.mxu1 %v1942_v39 }
  0x9b   :  { %1062 = vmatpush1.bf16.msra.mxu0 %v1949_v40 }
  0x9c   :  { %1103 = vmatpush1.bf16.msra.mxu1 %v1954_v41  ;;  %1063 = vmatprep.subr.bf16.mxu0 %v1961_v42 }
  0x9d   :  { %1104 = vmatprep.subr.bf16.mxu1 %v1966_v43 }
  0x9f   :  { %1064 = vmatpush1.bf16.msra.mxu0 %v1973_v44 }
  0xa0   :  { %1105 = vmatpush1.bf16.msra.mxu1 %v1978_v45  ;;  %1065 = vmatprep.subr.bf16.mxu0 %v1985_v46 }
  0xa1   :  { %1106 = vmatprep.subr.bf16.mxu1 %v1990_v47 }
  0xa3   :  { %1066 = vmatpush2.bf16.msra.mxu0 %v1997_v50 }
  0xa4   :  { %1107 = vmatpush2.bf16.msra.mxu1 %v2002_v51  ;;  %1067 = vmatprep.subr.bf16.mxu0 %v2009_v52 }
  0xa5   :  { %1108 = vmatprep.subr.bf16.mxu1 %v2014_v53 }
  0xa7   :  { %1068 = vmatpush2.bf16.msra.mxu0 %v2021_v54 }
  0xa8   :  { %1109 = vmatpush2.bf16.msra.mxu1 %v2026_v55  ;;  %1069 = vmatprep.subr.bf16.mxu0 %v2033_v56 }
  0xa9   :  { %1110 = vmatprep.subr.bf16.mxu1 %v2038_v57 }
  0xab   :  { %1070 = vmatpush2.bf16.msra.mxu0 %v2045_v58 }
  0xac   :  { %1111 = vmatpush2.bf16.msra.mxu1 %v2050_v59  ;;  %1071 = vmatprep.subr.bf16.mxu0 %v2057_v60 }
  0xad   :  { %1112 = vmatprep.subr.bf16.mxu1 %v2062_v61 }
  0xaf   :  { %1072 = vmatpush2.bf16.msra.mxu0 %v2069_v62  ;;  %v1531_v62 = vmov 1966171168  }
  0xb0   :  { %1113 = vmatpush2.bf16.msra.mxu1 %v2074_v63  ;;  %1073 = vmatprep.subr.bf16.mxu0 %v2081_v0  ;;  %v1149_v63 = vunpack.c.l.s4 %v1531_v62  ;;  %v1151_v0 = vlaneseq }
  0xb1   :  { %1114 = vmatprep.subr.bf16.mxu1 %v2086_v1 }
  0xb2   :  { %v1150_v1 = vunpack.c.0.s8 %v1149_v63 }
  0xb3   :  { %1074 = vmatpush2.bf16.msra.mxu0 %v2093_v2  ;;  %v1152_v2 = vshrl.u32 %v1151_v0, 7 }
  0xb4   :  { %1115 = vmatpush2.bf16.msra.mxu1 %v2098_v3  ;;  %1075 = vmatprep.subr.bf16.mxu0 %v2105_v6 }
  0xb5   :  { %1116 = vmatprep.subr.bf16.mxu1 %v2110_v8  ;;  %v1153_v6 = vsub.s32 %v1150_v1, %v1152_v2  ;;  %v1172_v4 = vsub.s32 0, %v1152_v2  ;;  %v1176_v5 = vsub.s32 1, %v1152_v2 }
  0xb7   :  { %1076 = vmatpush2.bf16.msra.mxu0 %v2282_v7 }
  0xb8   :  { %1117 = vmatpush2.bf16.msra.mxu1 %v2283_v9  ;;  %1077 = vmatprep.subr.bf16.mxu0 %v2284_v13 }
  0xb9   :  { %1118 = vmatprep.subr.bf16.mxu1 %v2285_v14 }
  0xbb   :  { %1078 = vmatpush2.bf16.msra.mxu0 %v2288_v20 }
  0xbc   :  { %1119 = vmatpush2.bf16.msra.mxu1 %v2289_v21  ;;  %1079 = vmatprep.subr.bf16.mxu0 %v2153_v10  ;;  %v2290_v21 = vld [vmem:[#allocation2_spill] sm:$0xff] }
  0xbd   :  { %1120 = vmatprep.subr.bf16.mxu1 %v2158_v15 }
  0xbf   :  { %1080 = vmatpush2.bf16.msra.mxu0 %v2165_v49 }
  0xc0   :  { %1121 = vmatpush2.bf16.msra.mxu1 %v2170_v48 }
  0xc2   :  { %1082 = vmatmul.mubr.bf16.vlgmr.msra.gmra.mxu0 %v113_v11 }
  0xc3   :  { %1123 = vmatmul.mubr.bf16.vlgmr.msra.gmra.mxu1 %v115_v12  ;;  %v2291_v12 = vld [vmem:[#allocation3_spill] sm:$0xff] }
 0x102   :  { %v599_v22 = vpop.f32.mrf.mxu0 }
 0x103   :  { %v640_v23 = vpop.f32.mrf.mxu1 }
 0x104   :  { %v641_v24 = vadd.f32 %v640_v23, %v599_v22  ;;  %v601_v25 = vpop.f32.mrf.mxu0 }
 0x105   :  { %v642_v26 = vpop.f32.mrf.mxu1 }
 0x106   :  { %v643_v27 = vadd.f32 %v642_v26, %v601_v25  ;;  %v603_v28 = vpop.f32.mrf.mxu0 }
 0x107   :  { %v644_v29 = vpop.f32.mrf.mxu1 }
 0x108   :  { %v604_v30 = vpop.f32.mrf.mxu0 }
 0x109   :  { %v645_v31 = vpop.f32.mrf.mxu1 }
 0x142   :  { %v1001_v32 = vpop.f32.mrf.mxu0 }
 0x143   :  { %v1042_v33 = vpop.f32.mrf.mxu1  ;;  %v1002_v34 = vadd.f32 %v1001_v32, %v641_v24 }
 0x144   :  { %v1003_v35 = vpop.f32.mrf.mxu0 }
 0x145   :  { %v1044_v36 = vpop.f32.mrf.mxu1  ;;  %v1043_v49 = vadd.f32 %v1042_v33, %v1002_v34  ;;  %v1004_v37 = vadd.f32 %v1003_v35, %v643_v27 }
 0x146   :  { %v1005_v48 = vpop.f32.mrf.mxu0 }
 0x147   :  { %v1046_v38 = vpop.f32.mrf.mxu1  ;;  %v1045_v39 = vadd.f32 %v1044_v36, %v1004_v37 }
 0x148   :  { %v1006_v40 = vpop.f32.mrf.mxu0 }
 0x149   :  { %v1047_v41 = vpop.f32.mrf.mxu1 }
 0x182   :  { %v1083_v42 = vpop.f32.mrf.mxu0 }
 0x183   :  { %v1124_v43 = vpop.f32.mrf.mxu1 }
 0x184   :  { %v1125_v44 = vadd.f32 %v1124_v43, %v1083_v42  ;;  %v1085_v45 = vpop.f32.mrf.mxu0 }
 0x185   :  { %v1126_v46 = vpop.f32.mrf.mxu1 }
 0x186   :  { %v1131_v47 = vadd.f32 %v1125_v44, %v1043_v49  ;;  %v1127_v50 = vadd.f32 %v1126_v46, %v1085_v45  ;;  %v1087_v51 = vpop.f32.mrf.mxu0 }
 0x187   :  { %v1128_v52 = vpop.f32.mrf.mxu1 }
 0x188   :  { %v1326_v53 = vmul.f32 -1.442695, %v1131_v47  ;;  %v1132_v54 = vadd.f32 %v1127_v50, %v1045_v39  ;;  %v1088_v55 = vpop.f32.mrf.mxu0 }
 0x189   :  { %v1129_v56 = vpop.f32.mrf.mxu1 }
 0x18a   :  { %1523 = vpow2.f32 %v1326_v53  ;;  %v1327_v57 = vmul.f32 -1.442695, %v1132_v54 }
 0x18c   :  { %1525 = vpow2.f32 %v1327_v57 }
 0x197   :  { %v1524_v58 = vpop.eup %1523 }
 0x198   :  { %v1139_v59 = vadd.f32 1.0, %v1524_v58 }
 0x199   :  { %v1526_v60 = vpop.eup %1525 }
 0x19a   :  { %v1140_v61 = vadd.f32 1.0, %v1526_v60  ;;  %1527 = vrcp.f32 %v1139_v59 }
 0x19c   :  { %1529 = vrcp.f32 %v1140_v61 }
 0x1a7   :  { %v1528_v3 = vpop.eup %1527 }
 0x1a9   :  { %v1530_v8 = vpop.eup %1529 }
 0x1aa   :  { %v1147_v10 = vcombine.low %v1528_v3, %v1530_v8 }
 0x1ac   :  { %v1154_v15 = vrot.slane %v1147_v10, %v1153_v6 }
 0x1ae   :  { %v1155_v7 = vcombine.high %v1154_v15, %v1154_v15  ;;  %v1162_v9 = vrot.slane %v1154_v15, %v1153_v6 }
 0x1b0   :  { %v1169_v13 = vrot.slane %v1155_v7, %v1153_v6  ;;  %v1173_v14 = vrot.slane %v1162_v9, %v1172_v4  ;;  %v1177_v16 = vrot.slane %v1162_v9, %v1176_v5 }
 0x1b2   :  { %v1181_v17 = vrot.slane %v1169_v13, %v1172_v4  ;;  %v1185_v18 = vrot.slane %v1169_v13, %v1176_v5  ;;  %v1186_v19 = vcombine.low %v1173_v14, %v1177_v16 }
 0x1b4   :  { %v1187_v20 = vcombine.low %v1181_v17, %v1185_v18  ;;  %v1190_v11 = vmul.f32 %v1186_v19, %v2290_v21 }
 0x1b6   :  { %v1191_v22 = vmul.f32 %v1187_v20, %v2291_v12  ;;  %1192 = vst [vmem:[%s2261_s3] sm:$0xff] %v1190_v11 }
 0x1b8   :  { %1193 = vst [vmem:[%s2261_s3 + $0x8] sm:$0xff] %v1191_v22 }

</bundles_post_ra>
